<compile_context>
chip_gen: v5e
topology: v5e:2x2
jax: 0.10.0
libtpu: 0.0.40
codegen_flags: <defaults>
</compile_context>

<pallas_src>
import functools
import math

import jax
import jax.numpy as jnp
from jax import lax
from jax.experimental import pallas as pl
from jax.experimental.pallas import tpu as pltpu


# ---------------------------------------------------------------------------
# Kernels
# ---------------------------------------------------------------------------
def _gcn_layer_kernel(adj_ref, x_ref, w_ref, out_ref, *, apply_relu):
    """One GCN layer on a row slab: out = act(adj_slab @ (X @ W)), no bias.

    adj_ref: [TM, N] bf16 (row slab of adjacency)
    x_ref:   [N, Din] bf16 (full node features / previous layer output)
    w_ref:   [Din, Dout] bf16 (Dout padded to 128)
    out_ref: [TM, Dout] bf16
    X @ W is recomputed per slab; its FLOPs are a small fraction (Din/TM) of
    the adj matmul and the full X / W blocks are DMA'd only once (constant
    index_map -> block revisiting), so this keeps the row axis "parallel".
    """
    xw = jnp.dot(x_ref[...], w_ref[...], preferred_element_type=jnp.float32)
    h = jnp.dot(adj_ref[...], xw.astype(jnp.bfloat16),
                preferred_element_type=jnp.float32)
    if apply_relu:
        h = jnp.maximum(h, 0.0)
    out_ref[...] = h.astype(out_ref.dtype)


def _decoder_kernel(zi_ref, zj_ref, out_ref):
    """adj_logits tile: out[i, j] = Z[i_slab] @ Z[j_slab]^T.

    Contract the trailing dim of both operands directly (no transpose / XLU).
    """
    out_ref[...] = lax.dot_general(
        zi_ref[...],
        zj_ref[...],
        dimension_numbers=(((1,), (1,)), ((), ())),
        preferred_element_type=jnp.float32,
    )


# ---------------------------------------------------------------------------
# Wrappers
# ---------------------------------------------------------------------------
def _pick_tile(n):
    for t in (512, 256, 128):
        if n % t == 0:
            return t
    return n


def _pad2d(w, rows, cols, dtype):
    out = jnp.zeros((rows, cols), dtype)
    return out.at[: w.shape[0], : w.shape[1]].set(w.astype(dtype))


def _gcn_layer(adj_b, x_b, w_b, *, apply_relu, tm):
    n = adj_b.shape[0]
    din = x_b.shape[1]
    dout = w_b.shape[1]
    grid_m = n // tm
    flops = 2 * n * n * dout + grid_m * 2 * n * din * dout
    bytes_accessed = 2 * (n * n + n * din + din * dout + n * dout)
    return pl.pallas_call(
        functools.partial(_gcn_layer_kernel, apply_relu=apply_relu),
        out_shape=jax.ShapeDtypeStruct((n, dout), jnp.bfloat16),
        grid=(grid_m,),
        in_specs=[
            pl.BlockSpec((tm, n), lambda i: (i, 0)),
            pl.BlockSpec((n, din), lambda i: (0, 0)),
            pl.BlockSpec((din, dout), lambda i: (0, 0)),
        ],
        out_specs=pl.BlockSpec((tm, dout), lambda i: (i, 0)),
        compiler_params=pltpu.CompilerParams(
            dimension_semantics=("parallel",)),
        cost_estimate=pl.CostEstimate(
            flops=flops, transcendentals=0, bytes_accessed=bytes_accessed),
    )(adj_b, x_b, w_b)


def _decode(z_b, *, tm, tn):
    n, dz = z_b.shape
    return pl.pallas_call(
        _decoder_kernel,
        out_shape=jax.ShapeDtypeStruct((n, n), jnp.float32),
        grid=(n // tm, n // tn),
        in_specs=[
            pl.BlockSpec((tm, dz), lambda i, j: (i, 0)),
            pl.BlockSpec((tn, dz), lambda i, j: (j, 0)),
        ],
        out_specs=pl.BlockSpec((tm, tn), lambda i, j: (i, j)),
        compiler_params=pltpu.CompilerParams(
            dimension_semantics=("parallel", "parallel")),
        cost_estimate=pl.CostEstimate(
            flops=2 * n * n * dz,
            transcendentals=0,
            bytes_accessed=2 * (2 * n * dz) + 4 * n * n),
    )(z_b, z_b)


def vgae_forward(adj, features, w0, w1):
    """GAE forward: adj_logits = Z @ Z^T with Z = ReLU(adj @ ((adj @ (X W0)) W1))."""
    n, f = features.shape
    dim_h = w0.shape[1]
    dim_z = w1.shape[1]
    assert adj.shape == (n, n)
    assert w0.shape == (f, dim_h)
    assert w1.shape == (dim_h, dim_z)

    bf = jnp.bfloat16
    round_up = lambda v, m: (v + m - 1) // m * m
    hp = round_up(dim_h, 128)
    zp = round_up(dim_z, 128)

    # bf16 inputs (f32 accumulation happens inside the kernels); zero-pad the
    # tiny hidden/latent dims up to 128 for lane-dense MXU tiles — the padded
    # zeros propagate through every matmul exactly.
    adj_b = adj.astype(bf)
    feat_b = features.astype(bf)
    w0_p = _pad2d(w0, f, hp, bf)
    w1_p = _pad2d(w1, hp, zp, bf)

    tm = _pick_tile(n)

    # TODO(synk): VGAE reparameterization branch (gae=False) is unreachable in
    # the reference module (self.layers[2] is never created), so only the GAE
    # path is implemented.
    hidden = _gcn_layer(adj_b, feat_b, w0_p, apply_relu=False, tm=tm)   # [N, 128]
    z = _gcn_layer(adj_b, hidden, w1_p, apply_relu=True, tm=tm)         # [N, 128]
    adj_logits = _decode(z, tm=tm, tn=tm)                               # [N, N] f32
    return adj_logits


def xavier_uniform(key, fan_in, fan_out):
    bound = math.sqrt(6.0 / (fan_in + fan_out))
    return jax.random.uniform(
        key, (fan_in, fan_out), dtype=jnp.float32, minval=-bound, maxval=bound
    )


# ---------------------------------------------------------------------------
# Demo / correctness check
# ---------------------------------------------------------------------------
if __name__ == "__main__":
    N, dim_feats, dim_h, dim_z = 128, 64, 32, 16

    key = jax.random.PRNGKey(0)
    k_adj, k_feat, k_w0, k_w1 = jax.random.split(key, 4)

    # Symmetric, self-looped, row-normalized adjacency (typical GCN input).
    a = (jax.random.uniform(k_adj, (N, N)) > 0.9).astype(jnp.float32)
    a = jnp.maximum(a, a.T) + jnp.eye(N, dtype=jnp.float32)
    adj = a / jnp.sum(a, axis=1, keepdims=True)

    features = jax.random.normal(k_feat, (N, dim_feats), dtype=jnp.float32)

    w0 = xavier_uniform(k_w0, dim_feats, dim_h)
    w1 = xavier_uniform(k_w1, dim_h, dim_z)

    adj_logits = vgae_forward(adj, features, w0, w1)
    jax.block_until_ready(adj_logits)
    assert adj_logits.shape == (N, N)

    # 1) Tight check vs. a reference that mirrors the kernel precision policy
    #    (bf16 operands, f32 accumulation) — verifies the Pallas implementation.
    bf = jnp.bfloat16
    adj_b, feat_b = adj.astype(bf), features.astype(bf)
    w0_b, w1_b = w0.astype(bf), w1.astype(bf)
    xw0 = jnp.dot(feat_b, w0_b, preferred_element_type=jnp.float32).astype(bf)
    hid = jnp.dot(adj_b, xw0, preferred_element_type=jnp.float32).astype(bf)
    xw1 = jnp.dot(hid, w1_b, preferred_element_type=jnp.float32).astype(bf)
    z_m = jnp.maximum(
        jnp.dot(adj_b, xw1, preferred_element_type=jnp.float32), 0.0
    ).astype(bf)
    ref_mixed = lax.dot_general(
        z_m, z_m, (((1,), (1,)), ((), ())), preferred_element_type=jnp.float32)
    assert jnp.allclose(adj_logits, ref_mixed, atol=1e-2, rtol=1e-2)

    # 2) Looser check vs. the pure-f32 module semantics (bf16 rounding error).
    hidden_f = adj @ (features @ w0)
    z_f = jnp.maximum(adj @ (hidden_f @ w1), 0.0)
    ref_f32 = z_f @ z_f.T
    assert jnp.allclose(adj_logits, ref_f32, atol=1e-1, rtol=1e-1)

    print("KERNEL_OK")
</pallas_src>

<mosaic_0001>
module attributes {stable_mosaic.version = 11 : i64} {
  func.func @_gcn_layer_kernel(%arg0: i32, %arg1: memref<128x128xbf16, #tpu.memory_space<vmem>>, %arg2: memref<128x64xbf16, #tpu.memory_space<vmem>>, %arg3: memref<64x128xbf16, #tpu.memory_space<vmem>>, %arg4: memref<128x128xbf16, #tpu.memory_space<vmem>>) attributes {dimension_semantics = [#tpu.dimension_semantics<parallel>], iteration_bounds = array<i64: 1>, scalar_prefetch = 0 : i64, scratch_operands = 0 : i64, tpu.core_type = #tpu.core_type<tc>, window_params = [{transform_indices = @transform_0, window_bounds = array<i64: 128, 128>}, {pipeline_mode = #tpu.pipeline_mode<synchronous>, transform_indices = @transform_1, window_bounds = array<i64: 128, 64>}, {pipeline_mode = #tpu.pipeline_mode<synchronous>, transform_indices = @transform_2, window_bounds = array<i64: 64, 128>}, {transform_indices = @transform_3, window_bounds = array<i64: 128, 128>}]} {
    %c0 = arith.constant 0 : index
    %c0_0 = arith.constant 0 : index
    %0 = vector.load %arg2[%c0, %c0_0] : memref<128x64xbf16, #tpu.memory_space<vmem>>, vector<128x64xbf16>
    %c0_1 = arith.constant 0 : index
    %c0_2 = arith.constant 0 : index
    %1 = vector.load %arg3[%c0_1, %c0_2] : memref<64x128xbf16, #tpu.memory_space<vmem>>, vector<64x128xbf16>
    %cst = arith.constant dense<0.000000e+00> : vector<128x128xf32>
    %2 = tpu.matmul %0, %1, %cst {dimension_numbers = #tpu.dot_dimension_numbers<[1], [0], [0], [1], [0, 0, 1, 1], [], []>} : vector<128x64xbf16>, vector<64x128xbf16>, vector<128x128xf32> -> vector<128x128xf32>
    %c0_3 = arith.constant 0 : index
    %c0_4 = arith.constant 0 : index
    %3 = vector.load %arg1[%c0_3, %c0_4] : memref<128x128xbf16, #tpu.memory_space<vmem>>, vector<128x128xbf16>
    %4 = arith.truncf %2 : vector<128x128xf32> to vector<128x128xbf16>
    %cst_5 = arith.constant dense<0.000000e+00> : vector<128x128xf32>
    %5 = tpu.matmul %3, %4, %cst_5 {dimension_numbers = #tpu.dot_dimension_numbers<[1], [0], [0], [1], [0, 0, 1, 1], [], []>} : vector<128x128xbf16>, vector<128x128xbf16>, vector<128x128xf32> -> vector<128x128xf32>
    %6 = arith.truncf %5 : vector<128x128xf32> to vector<128x128xbf16>
    %c0_6 = arith.constant 0 : index
    %c0_7 = arith.constant 0 : index
    %7 = vector.load %arg4[%c0_6, %c0_7] : memref<128x128xbf16, #tpu.memory_space<vmem>>, vector<128x128xbf16>
    tpu.vector_store %arg4[%c0_6, %c0_7], %6 {strides = array<i32>} : memref<128x128xbf16, #tpu.memory_space<vmem>>, vector<128x128xbf16>,
    return
  }
  func.func @transform_0(%arg0: i32) -> (i32, i32) {
    %c0_i32 = arith.constant 0 : i32
    %c0_i32_0 = arith.constant 0 : i32
    return %arg0, %c0_i32 : i32, i32
  }
  func.func @transform_1(%arg0: i32) -> (i32, i32) {
    %c0_i32 = arith.constant 0 : i32
    %c0_i32_0 = arith.constant 0 : i32
    %c0_i32_1 = arith.constant 0 : i32
    return %c0_i32, %c0_i32_0 : i32, i32
  }
  func.func @transform_2(%arg0: i32) -> (i32, i32) {
    %c0_i32 = arith.constant 0 : i32
    %c0_i32_0 = arith.constant 0 : i32
    %c0_i32_1 = arith.constant 0 : i32
    return %c0_i32, %c0_i32_0 : i32, i32
  }
  func.func @transform_3(%arg0: i32) -> (i32, i32) {
    %c0_i32 = arith.constant 0 : i32
    %c0_i32_0 = arith.constant 0 : i32
    return %arg0, %c0_i32 : i32, i32
  }
}

</mosaic_0001>

<bundles_post_ra>
// kernel: tpu_custom_call.1
= control target key start
LH: loop header
LB: loop body
LE: loop exit
PB: predicated region body
PF: predicated region fallthrough
CT: control target
= control target key end

     0   :  { %s631_s0 = inlined_call_operand.vmem [shape: bf16[128,128], index: 0, kind: input, shape index: {}]   ;;  %s632_s1 = inlined_call_operand.vmem [shape: bf16[128,64], index: 1, kind: input, shape index: {}]   ;;  %s633_s2 = inlined_call_operand.vmem [shape: bf16[64,128], index: 2, kind: input, shape index: {}]   ;;  %s634_s3 = inlined_call_operand.hbm [shape: bf16[128,128], index: 3, kind: output, shape index: {}]  }
   0x1   :  { %v448_v0 = vld [vmem:[%s633_s2 + $0x18] sm:$0xff]  ;;  %v447_v1 = vld [vmem:[%s633_s2 + $0x10] sm:$0xff] }
   0x2   :  { %133 = vmatpush.bf16.msra.mxu0 %v448_v0  ;;  %504 = vmatpush.bf16.msra.mxu3 %v448_v0 }
   0x3   :  { %8 = vsyncpa [#allocation3], 0  ;;  %v446_v2 = vld [vmem:[%s633_s2 + $0x8] sm:$0xff]  ;;  %v445_v3 = vld [vmem:[%s633_s2] sm:$0xff]  ;;  %vm104_vm0 = vcmask 523264   ;;  %s337_s26 = sshll.u32 %s634_s3, 4  ;;  %s338_s26 = int_to_ptr.hbm [resolvable:$true] %s337_s26 }
   0x4   :  { %v437_v4 = vld [vmem:[%s632_s1] sm:$0xff]  ;;  %v442_v5 = vld [vmem:[%s632_s1 + $0x28] sm:$0xff]  ;;  %v443_v7 = vld [vmem:[%s632_s1 + $0x30] sm:$0xff]  ;;  %s546_s27 = smov 64   ;;  %s547_s2 = smov 4  }
   0x5   :  { %v438_v6 = vld [vmem:[%s632_s1 + $0x8] sm:$0xff]  ;;  %v439_v8 = vld [vmem:[%s632_s1 + $0x10] sm:$0xff]  ;;  %v444_v9 = vld [vmem:[%s632_s1 + $0x38] sm:$0xff] }
   0x6   :  { %134 = vmatpush.bf16.msra.mxu0 %v447_v1  ;;  %505 = vmatpush.bf16.msra.mxu3 %v447_v1  ;;  %v440_v10 = vld [vmem:[%s632_s1 + $0x18] sm:$0xff]  ;;  %v441_v11 = vld [vmem:[%s632_s1 + $0x20] sm:$0xff]  ;;  %v450_v38 = vld [vmem:[%s631_s0 + $0x8] sm:$0xff] }
   0x7   :  { %v449_v36 = vld [vmem:[%s631_s0] sm:$0xff]  ;;  %v454_v39 = vld [vmem:[%s631_s0 + $0x28] sm:$0xff]  ;;  %v451_v40 = vld [vmem:[%s631_s0 + $0x10] sm:$0xff] }
   0x8   :  { %v453_v37 = vld [vmem:[%s631_s0 + $0x20] sm:$0xff]  ;;  %v455_v41 = vld [vmem:[%s631_s0 + $0x30] sm:$0xff]  ;;  %v452_v42 = vld [vmem:[%s631_s0 + $0x18] sm:$0xff] }
   0x9   :  { %v456_v43 = vld [vmem:[%s631_s0 + $0x38] sm:$0xff]  ;;  %s545_s0 = smov [#allocation2]  }
   0xa   :  { %135 = vmatpush.bf16.msra.mxu0 %v446_v2  ;;  %506 = vmatpush.bf16.msra.mxu3 %v446_v2  ;;  %s335_s23 = sshll.u32 %s545_s0, 4  ;;  %s336_s23 = int_to_ptr.vmem [resolvable:$true] %s335_s23 }
   0xe   :  { %136 = vmatpush.bf16.msra.mxu0 %v445_v3  ;;  %507 = vmatpush.bf16.msra.mxu3 %v445_v3 }
  0x11   :  { %397 = vmatmul.msk.bf16.vlgmr.msra.gmra.mxu0 %vm104_vm0, %v437_v4  ;;  %402 = vmatmul.msk.bf16.vlgmr.msra.gmra.mxu3 %vm104_vm0, %v442_v5 }
  0x21   :  { %398 = vmatmul.msk.bf16.gmra.mxu0 %vm104_vm0, %v438_v6  ;;  %403 = vmatmul.msk.bf16.gmra.mxu3 %vm104_vm0, %v443_v7 }
  0x31   :  { %399 = vmatmul.msk.bf16.gmra.mxu0 %vm104_vm0, %v439_v8  ;;  %404 = vmatmul.msk.bf16.gmra.mxu3 %vm104_vm0, %v444_v9 }
  0x41   :  { %400 = vmatmul.msk.bf16.gmra.mxu0 %vm104_vm0, %v440_v10 }
  0x51   :  { %401 = vmatmul.msk.bf16.gmra.mxu0 %vm104_vm0, %v441_v11 }
  0x8e   :  { %v138_v12 = vpop.f32.mrf.mxu0 }
  0x94   :  { %v163_v13 = vpop.f32.mrf.mxu3 }
  0x96   :  { %v140_v14 = vpop.f32.mrf.mxu0 }
  0x97   :  { %v194_v15 = vpack.c.bf16 %v140_v14, %v138_v12 }
  0x9c   :  { %v165_v16 = vpop.f32.mrf.mxu3 }
  0x9d   :  { %v199_v28 = vpack.c.bf16 %v165_v16, %v163_v13 }
  0x9e   :  { %v143_v17 = vpop.f32.mrf.mxu0 }
  0xa4   :  { %v168_v18 = vpop.f32.mrf.mxu3 }
  0xa6   :  { %v145_v19 = vpop.f32.mrf.mxu0 }
  0xa7   :  { %v195_v35 = vpack.c.bf16 %v145_v19, %v143_v17 }
  0xac   :  { %v170_v20 = vpop.f32.mrf.mxu3 }
  0xad   :  { %v200_v27 = vpack.c.bf16 %v170_v20, %v168_v18 }
  0xae   :  { %v148_v21 = vpop.f32.mrf.mxu0 }
  0xb4   :  { %v173_v22 = vpop.f32.mrf.mxu3 }
  0xb6   :  { %v150_v23 = vpop.f32.mrf.mxu0 }
  0xb7   :  { %v196_v34 = vpack.c.bf16 %v150_v23, %v148_v21 }
  0xbc   :  { %v175_v24 = vpop.f32.mrf.mxu3 }
  0xbd   :  { %v201_v25 = vpack.c.bf16 %v175_v24, %v173_v22 }
  0xbe   :  { %v153_v26 = vpop.f32.mrf.mxu0 }
  0xbf   :  { %250 = vmatpush.bf16.msra.mxu1 %v201_v25  ;;  %508 = vmatpush.bf16.msra.mxu2 %v201_v25 }
  0xc3   :  { %251 = vmatpush.bf16.msra.mxu1 %v200_v27  ;;  %509 = vmatpush.bf16.msra.mxu2 %v200_v27 }
  0xc6   :  { %v155_v29 = vpop.f32.mrf.mxu0 }
  0xc7   :  { %252 = vmatpush.bf16.msra.mxu1 %v199_v28  ;;  %510 = vmatpush.bf16.msra.mxu2 %v199_v28  ;;  %v197_v33 = vpack.c.bf16 %v155_v29, %v153_v26 }
  0xce   :  { %v158_v30 = vpop.f32.mrf.mxu0 }
  0xd6   :  { %v160_v31 = vpop.f32.mrf.mxu0 }
  0xd7   :  { %v198_v32 = vpack.c.bf16 %v160_v31, %v158_v30 }
  0xd9   :  { %253 = vmatpush.bf16.msra.mxu1 %v198_v32  ;;  %511 = vmatpush.bf16.msra.mxu2 %v198_v32 }
  0xdd   :  { %254 = vmatpush.bf16.msra.mxu1 %v197_v33  ;;  %512 = vmatpush.bf16.msra.mxu2 %v197_v33 }
  0xe1   :  { %255 = vmatpush.bf16.msra.mxu1 %v196_v34  ;;  %513 = vmatpush.bf16.msra.mxu2 %v196_v34 }
  0xe5   :  { %256 = vmatpush.bf16.msra.mxu1 %v195_v35  ;;  %514 = vmatpush.bf16.msra.mxu2 %v195_v35 }
  0xe9   :  { %257 = vmatpush.bf16.msra.mxu1 %v194_v15  ;;  %515 = vmatpush.bf16.msra.mxu2 %v194_v15 }
  0xec   :  { %258 = vmatmul.bf16.vlgmr.msra.gmra.mxu1 %v449_v36  ;;  %278 = vmatmul.bf16.vlgmr.msra.gmra.mxu2 %v453_v37 }
  0xfc   :  { %263 = vmatmul.bf16.gmra.mxu1 %v450_v38  ;;  %283 = vmatmul.bf16.gmra.mxu2 %v454_v39 }
 0x10c   :  { %268 = vmatmul.bf16.gmra.mxu1 %v451_v40  ;;  %288 = vmatmul.bf16.gmra.mxu2 %v455_v41 }
 0x11c   :  { %273 = vmatmul.bf16.gmra.mxu1 %v452_v42  ;;  %293 = vmatmul.bf16.gmra.mxu2 %v456_v43 }
 0x169   :  { %v259_v44 = vpop.f32.mrf.mxu1 }
 0x16f   :  { %v279_v45 = vpop.f32.mrf.mxu2 }
 0x171   :  { %v261_v46 = vpop.f32.mrf.mxu1 }
 0x172   :  { %v460_v47 = vpack.c.bf16 %v261_v46, %v259_v44 }
 0x174   :  { %461 = vst [vmem:[#allocation2] sm:$0xff] %v460_v47  }
 0x177   :  { %v281_v48 = vpop.f32.mrf.mxu2 }
 0x178   :  { %v480_v49 = vpack.c.bf16 %v281_v48, %v279_v45 }
 0x179   :  { %v264_v50 = vpop.f32.mrf.mxu1 }
 0x17a   :  { %500 = vst [vmem:[#allocation2 + $0x20] sm:$0xff] %v480_v49  }
 0x17f   :  { %v284_v51 = vpop.f32.mrf.mxu2 }
 0x181   :  { %v266_v52 = vpop.f32.mrf.mxu1 }
 0x182   :  { %v465_v53 = vpack.c.bf16 %v266_v52, %v264_v50 }
 0x184   :  { %497 = vst [vmem:[#allocation2 + $0x8] sm:$0xff] %v465_v53  }
 0x187   :  { %v286_v54 = vpop.f32.mrf.mxu2 }
 0x188   :  { %v485_v55 = vpack.c.bf16 %v286_v54, %v284_v51 }
 0x189   :  { %v269_v56 = vpop.f32.mrf.mxu1 }
 0x18a   :  { %501 = vst [vmem:[#allocation2 + $0x28] sm:$0xff] %v485_v55  }
 0x18f   :  { %v289_v57 = vpop.f32.mrf.mxu2 }
 0x191   :  { %v271_v58 = vpop.f32.mrf.mxu1 }
 0x192   :  { %v470_v59 = vpack.c.bf16 %v271_v58, %v269_v56 }
 0x194   :  { %498 = vst [vmem:[#allocation2 + $0x10] sm:$0xff] %v470_v59  }
 0x197   :  { %v291_v60 = vpop.f32.mrf.mxu2 }
 0x198   :  { %v490_v61 = vpack.c.bf16 %v291_v60, %v289_v57 }
 0x199   :  { %v274_v62 = vpop.f32.mrf.mxu1 }
 0x19a   :  { %502 = vst [vmem:[#allocation2 + $0x30] sm:$0xff] %v490_v61  }
 0x19f   :  { %v294_v63 = vpop.f32.mrf.mxu2 }
 0x1a1   :  { %v276_v0 = vpop.f32.mrf.mxu1 }
 0x1a2   :  { %v475_v1 = vpack.c.bf16 %v276_v0, %v274_v62 }
 0x1a4   :  { %499 = vst [vmem:[#allocation2 + $0x18] sm:$0xff] %v475_v1  }
 0x1a7   :  { %v296_v2 = vpop.f32.mrf.mxu2 }
 0x1a8   :  { %v495_v3 = vpack.c.bf16 %v296_v2, %v294_v63 }
 0x1aa   :  { %503 = vst [vmem:[#allocation2 + $0x38] sm:$0xff] %v495_v3  }
 0x1ab   :  { %343 = dma.vmem_to_hbm [thread:$0]  %s336_s23, 1024, %s338_s26, [#allocation3], %s546_s27, %s546_s27, %s547_s2  }
 0x1ac   :  { %543 = dma.done.wait [#allocation3], 1024  }
 0x1ad   :  { %544 = vsyncadd [#allocation3], 4294966272 }
 0x1ae   :  { %348 = vsyncpa [#allocation3], 1 }

</bundles_post_ra>
